<compile_context>
chip_gen: v7x
topology: tpu7x:2x2x1
jax: 0.10.0
libtpu: 0.0.40
codegen_flags: <defaults>
</compile_context>

<pallas_src>
import functools

import jax
import jax.numpy as jnp
from jax.experimental import pallas as pl
from jax.experimental.pallas import tpu as pltpu


# ---------------------------------------------------------------------------
# Hardware-aware budgets
# ---------------------------------------------------------------------------
def _device_kind():
    try:
        return jax.devices()[0].device_kind.lower()
    except Exception:
        return ""


def _vmem_budget_bytes():
    """Total budget for all double-buffered tiles; stays comfortably under the
    scoped-VMEM default of every generation (16 MiB v5e, 32 MiB v6e/v7x)."""
    kind = _device_kind()
    if ("v6" in kind) or ("v7" in kind) or ("7x" in kind) or ("tpu7" in kind):
        return 20 * 1024 * 1024
    return 12 * 1024 * 1024


def _min_grid_steps():
    """v7x has 2 TensorCores sharing 3.2 TB/s HBM; make sure both get work."""
    kind = _device_kind()
    if ("v7" in kind) or ("7x" in kind) or ("tpu7" in kind):
        return 4
    return 1


# ---------------------------------------------------------------------------
# Tiling policy
# ---------------------------------------------------------------------------
def _divisors(n):
    ds = set()
    i = 1
    while i * i <= n:
        if n % i == 0:
            ds.add(i)
            ds.add(n // i)
        i += 1
    return sorted(ds)


def _choose_tiles(B, N, itemsize, n_arrays):
    """Pick (TB, TN) for the flattened (B, N) layout.

    N must already be a multiple of 128 (wrappers pad).
    TB: divisor of B that is a multiple of 8 (full B as a legal fallback).
    TN: divisor of N that is a multiple of 128.
    Both grow until the per-tile budget is reached; then, if the grid collapsed
    to ~1 step, it is split so both TensorCores get work (v7x) while keeping
    tiles >= 128 KiB (still on the HBM roofline).
    """
    per_tile_budget = max(128 * 1024, _vmem_budget_bytes() // (2 * n_arrays))
    sub = max(8, 32 // max(1, itemsize))  # sublane pack for this dtype

    # minimum legal batch tile
    if B % sub == 0:
        row_min = sub
    elif B % 8 == 0:
        row_min = 8
    else:
        row_min = B  # full-extent block is always legal

    # feature tile: largest 128-multiple divisor of N within budget at row_min
    tn = 128
    for d in _divisors(N // 128):
        cand = 128 * d
        if cand * row_min * itemsize <= per_tile_budget:
            tn = max(tn, cand)

    # batch tile: largest legal divisor of B within budget at the chosen tn
    tb = row_min
    if row_min != B:
        for d in _divisors(B):
            if d % 8 == 0 and d * tn * itemsize <= per_tile_budget:
                tb = max(tb, d)
        if B * tn * itemsize <= per_tile_budget:
            tb = max(tb, B)  # full extent is also a legal block dim

    # split the grid for megacore parallelism if it collapsed to too few steps
    min_tile_bytes = 128 * 1024
    target = _min_grid_steps()
    while (B // tb) * (N // tn) < target:
        if tb % 16 == 0 and (tb // 2) * tn * itemsize >= min_tile_bytes:
            tb //= 2
        elif tn % 256 == 0 and tb * (tn // 2) * itemsize >= min_tile_bytes:
            tn //= 2
        else:
            break
    return tb, tn


# ---------------------------------------------------------------------------
# Kernels
# ---------------------------------------------------------------------------
def _drop_path_kernel(rand_ref, x_ref, o_ref, *, keep_prob, inv_keep):
    # rand_ref: (TB, 1) f32 uniform samples for this batch tile (resident
    # across the inner feature-grid loop). x_ref/o_ref: (TB, TN) tiles.
    u = rand_ref[...]                                # f32
    scale = jnp.floor(keep_prob + u) * inv_keep      # (TB, 1) f32 in {0, 1/kp}
    xf = x_ref[...].astype(jnp.float32)
    o_ref[...] = (xf * scale).astype(o_ref.dtype)    # cast only the product


def _drop_path_add_kernel(rand_ref, x_ref, res_ref, o_ref, *, keep_prob, inv_keep):
    # Fused: out = residual + drop_path(x). 3 HBM passes instead of 5.
    u = rand_ref[...]
    scale = jnp.floor(keep_prob + u) * inv_keep
    xf = x_ref[...].astype(jnp.float32)
    rf = res_ref[...].astype(jnp.float32)
    o_ref[...] = (xf * scale + rf).astype(o_ref.dtype)


# ---------------------------------------------------------------------------
# Wrappers
# ---------------------------------------------------------------------------
def _flatten_pad(x):
    """Flatten to (B, N) and pad N up to the next multiple of 128 so all
    stores are lane-dense and tn stays bounded by the divisor-based policy."""
    B = x.shape[0]
    N = 1
    for d in x.shape[1:]:
        N *= d
    x2 = x.reshape(B, N)
    Np = ((N + 127) // 128) * 128
    if Np != N:
        x2 = jnp.pad(x2, ((0, 0), (0, Np - N)))
    return x2, B, N, Np


def drop_path_pallas(x, rand, drop_prob: float, training: bool):
    """x: (B, ...); rand: (B,) uniform [0,1) samples (any float dtype)."""
    if drop_prob == 0.0 or not training:
        return x
    keep_prob = 1.0 - float(drop_prob)
    inv_keep = 1.0 / keep_prob

    x2, B, N, Np = _flatten_pad(x)
    rand2 = rand.astype(jnp.float32).reshape(B, 1)
    tb, tn = _choose_tiles(B, Np, jnp.dtype(x.dtype).itemsize, n_arrays=2)
    grid = (B // tb, Np // tn)

    kernel = functools.partial(_drop_path_kernel,
                               keep_prob=keep_prob, inv_keep=inv_keep)
    out = pl.pallas_call(
        kernel,
        out_shape=jax.ShapeDtypeStruct((B, Np), x.dtype),
        grid=grid,
        in_specs=[
            pl.BlockSpec((tb, 1), lambda i, j: (i, 0)),   # rand (resident over j)
            pl.BlockSpec((tb, tn), lambda i, j: (i, j)),  # x tile
        ],
        out_specs=pl.BlockSpec((tb, tn), lambda i, j: (i, j)),
        input_output_aliases={1: 0},                      # out reuses x's buffer
        compiler_params=pltpu.CompilerParams(
            dimension_semantics=("parallel", "parallel")),
    )(rand2, x2)
    if Np != N:
        out = out[:, :N]
    return out.reshape(x.shape)


def drop_path_add_pallas(x, residual, rand, drop_prob: float, training: bool):
    """Fused residual epilogue: residual + drop_path(x)."""
    if drop_prob == 0.0 or not training:
        return x + residual
    keep_prob = 1.0 - float(drop_prob)
    inv_keep = 1.0 / keep_prob

    x2, B, N, Np = _flatten_pad(x)
    res2, _, _, _ = _flatten_pad(residual.astype(x.dtype))
    rand2 = rand.astype(jnp.float32).reshape(B, 1)
    tb, tn = _choose_tiles(B, Np, jnp.dtype(x.dtype).itemsize, n_arrays=3)
    grid = (B // tb, Np // tn)

    kernel = functools.partial(_drop_path_add_kernel,
                               keep_prob=keep_prob, inv_keep=inv_keep)
    out = pl.pallas_call(
        kernel,
        out_shape=jax.ShapeDtypeStruct((B, Np), x.dtype),
        grid=grid,
        in_specs=[
            pl.BlockSpec((tb, 1), lambda i, j: (i, 0)),   # rand (resident over j)
            pl.BlockSpec((tb, tn), lambda i, j: (i, j)),  # x tile
            pl.BlockSpec((tb, tn), lambda i, j: (i, j)),  # residual tile
        ],
        out_specs=pl.BlockSpec((tb, tn), lambda i, j: (i, j)),
        input_output_aliases={2: 0},                      # out reuses residual's buffer
        compiler_params=pltpu.CompilerParams(
            dimension_semantics=("parallel", "parallel")),
    )(rand2, x2, res2)
    if Np != N:
        out = out[:, :N]
    return out.reshape(x.shape)


class DropPath:
    """Mirror of the PyTorch module: drop_prob is a static config scalar."""

    def __init__(self, drop_prob=None):
        self.drop_prob = 0.0 if drop_prob is None else float(drop_prob)
        self.training = True

    def __call__(self, x, key):
        # Tiny per-sample uniform draw (B f32 values) is plain-JAX glue; the
        # masking / scaling over (S, D) runs inside the Pallas kernel.
        rand = jax.random.uniform(key, (x.shape[0],), dtype=jnp.float32)
        return drop_path_pallas(x, rand, self.drop_prob, self.training)


# ---------------------------------------------------------------------------
# Self-test
# ---------------------------------------------------------------------------
if __name__ == "__main__":
    key = jax.random.PRNGKey(0)
    kx, kr, kres, kx2, kr2, kx3, kr3 = jax.random.split(key, 7)

    # --- small shape consistent with a CCT transformer-block token tensor ---
    B, S, D = 2, 8, 32
    drop_prob = 0.5
    keep_prob = 1.0 - drop_prob

    x = jax.random.normal(kx, (B, S, D), dtype=jnp.float32)
    residual = jax.random.normal(kres, (B, S, D), dtype=jnp.float32)
    rand = jax.random.uniform(kr, (B,), dtype=jnp.float32)

    mask = jnp.floor(keep_prob + rand).reshape(B, 1, 1)
    ref = x * (mask / keep_prob)
    ref_fused = ref + residual

    out = jax.block_until_ready(drop_path_pallas(x, rand, drop_prob, training=True))
    assert out.shape == x.shape and out.dtype == x.dtype
    assert jnp.allclose(out, ref, atol=1e-6, rtol=1e-6)

    out_f = jax.block_until_ready(
        drop_path_add_pallas(x, residual, rand, drop_prob, training=True))
    assert jnp.allclose(out_f, ref_fused, atol=1e-6, rtol=1e-6)

    # --- CCT config (feature_dim=256, num_patches=64), multi-tile grid ---
    B2, S2, D2 = 16, 64, 256
    x_big = jax.random.normal(kx2, (B2, S2, D2), dtype=jnp.float32)
    rand_big = jax.random.uniform(kr2, (B2,), dtype=jnp.float32)
    mask_big = jnp.floor(0.75 + rand_big).reshape(B2, 1, 1)
    ref_big = x_big * (mask_big / 0.75)
    out_big = jax.block_until_ready(
        drop_path_pallas(x_big, rand_big, 0.25, training=True))
    assert jnp.allclose(out_big, ref_big, atol=1e-5, rtol=1e-5)

    # bf16: scale math in f32, only the final product cast
    x_bf = x_big.astype(jnp.bfloat16)
    ref_bf = (x_bf.astype(jnp.float32) * (mask_big / 0.75)).astype(jnp.bfloat16)
    out_bf = jax.block_until_ready(
        drop_path_pallas(x_bf, rand_big, 0.25, training=True))
    assert out_bf.dtype == jnp.bfloat16
    assert jnp.allclose(out_bf.astype(jnp.float32), ref_bf.astype(jnp.float32),
                        atol=1e-2, rtol=1e-2)

    # --- feature extent not a multiple of 128 (exercises the padding path) ---
    B3, S3, D3 = 4, 7, 33
    x_odd = jax.random.normal(kx3, (B3, S3, D3), dtype=jnp.float32)
    rand_odd = jax.random.uniform(kr3, (B3,), dtype=jnp.float32)
    mask_odd = jnp.floor(0.5 + rand_odd).reshape(B3, 1, 1)
    ref_odd = x_odd * (mask_odd / 0.5)
    out_odd = jax.block_until_ready(
        drop_path_pallas(x_odd, rand_odd, 0.5, training=True))
    assert jnp.allclose(out_odd, ref_odd, atol=1e-6, rtol=1e-6)

    # --- eval / drop_prob==0 paths are identity ---
    module = DropPath(drop_prob)
    module.training = False
    out_eval = jax.block_until_ready(module(x, kr))
    assert jnp.array_equal(out_eval, x)
    assert jnp.array_equal(
        jax.block_until_ready(drop_path_pallas(x, rand, 0.0, training=True)), x)

    print("KERNEL_OK")
</pallas_src>

<mosaic_0001>
module attributes {stable_mosaic.version = 11 : i64} {
  func.func @_drop_path_kernel(%arg0: i32, %arg1: i32, %arg2: memref<2x1xf32, #tpu.memory_space<vmem>>, %arg3: memref<2x256xf32, #tpu.memory_space<vmem>>, %arg4: memref<2x256xf32, #tpu.memory_space<vmem>>) attributes {dimension_semantics = [#tpu.dimension_semantics<parallel>, #tpu.dimension_semantics<parallel>], iteration_bounds = array<i64: 1, 1>, scalar_prefetch = 0 : i64, scratch_operands = 0 : i64, tpu.core_type = #tpu.core_type<tc>, window_params = [{transform_indices = @transform_0, window_bounds = array<i64: 2, 1>}, {transform_indices = @transform_1, window_bounds = array<i64: 2, 256>}, {transform_indices = @transform_2, window_bounds = array<i64: 2, 256>}]} {
    %c0 = arith.constant 0 : index
    %c0_0 = arith.constant 0 : index
    %0 = vector.load %arg2[%c0, %c0_0] : memref<2x1xf32, #tpu.memory_space<vmem>>, vector<2x1xf32>
    %cst = arith.constant 5.000000e-01 : f32
    %1 = vector.broadcast %cst : f32 to vector<2x1xf32>
    %2 = arith.addf %1, %0 : vector<2x1xf32>
    %3 = math.floor %2 : vector<2x1xf32>
    %cst_1 = arith.constant 2.000000e+00 : f32
    %4 = vector.broadcast %cst_1 : f32 to vector<2x1xf32>
    %5 = arith.mulf %3, %4 : vector<2x1xf32>
    %c0_2 = arith.constant 0 : index
    %c0_3 = arith.constant 0 : index
    %6 = vector.load %arg3[%c0_2, %c0_3] : memref<2x256xf32, #tpu.memory_space<vmem>>, vector<2x256xf32>
    %7 = vector.broadcast %5 : vector<2x1xf32> to vector<2x256xf32>
    %8 = arith.mulf %6, %7 : vector<2x256xf32>
    %c0_4 = arith.constant 0 : index
    %c0_5 = arith.constant 0 : index
    %9 = vector.load %arg4[%c0_4, %c0_5] : memref<2x256xf32, #tpu.memory_space<vmem>>, vector<2x256xf32>
    tpu.vector_store %arg4[%c0_4, %c0_5], %8 {strides = array<i32>} : memref<2x256xf32, #tpu.memory_space<vmem>>, vector<2x256xf32>,
    return
  }
  func.func @transform_0(%arg0: i32, %arg1: i32) -> (i32, i32) {
    %c0_i32 = arith.constant 0 : i32
    %c0_i32_0 = arith.constant 0 : i32
    return %arg0, %c0_i32 : i32, i32
  }
  func.func @transform_1(%arg0: i32, %arg1: i32) -> (i32, i32) {
    %c0_i32 = arith.constant 0 : i32
    return %arg0, %arg1 : i32, i32
  }
  func.func @transform_2(%arg0: i32, %arg1: i32) -> (i32, i32) {
    %c0_i32 = arith.constant 0 : i32
    return %arg0, %arg1 : i32, i32
  }
}

</mosaic_0001>

<bundles_post_ra>
// kernel: tpu_custom_call.1
= control target key start
LH: loop header
LB: loop body
LE: loop exit
PB: predicated region body
PF: predicated region fallthrough
CT: control target
= control target key end

     0   :  { %7 = vsyncpa [#allocation3], 0  ;;  %s157_s0 = inlined_call_operand.vmem [shape: f32[2,1], index: 0, kind: input, shape index: {}]   ;;  %s158_s1 = inlined_call_operand.hbm [shape: f32[2,256], index: 1, kind: input, shape index: {}, may-alias: {1,2}]   ;;  %s159_s2 = inlined_call_operand.hbm [shape: f32[2,256], index: 2, kind: output, shape index: {}, may-alias: {1,2}]  }
   0x1   :  { %8 = vsyncpa [#allocation4], 0  ;;  %s111_s9 = smov [#allocation2]   ;;  %s63_s13 = scalar_lea.hbm %s158_s1, 64 }
   0x2   :  { %s17_s10 = sshll.u32 %s111_s9, 4  ;;  %p64_p0 = scmp.ne.s32.totalorder %s158_s1, %s63_s13  ;;  %s18_s10 = int_to_ptr.vmem [resolvable:$true] %s17_s10 }
   0x3   :  { %p67_p1 = scmp.lt.u32.totalorder %s63_s13, %s158_s1 }
   0x5   :  { %p69_p2 = pnand %p67_p1, %p64_p0 }
   0x7   :  { %72 = shalt.err (!%p69_p2)
}
   0x8   :  { %s73_s18 = scalar_lea.vmem %s18_s10, 64  ;;  %p78_p4 = scmp.lt.s32.totalorder %s18_s10, %s18_s10 }
   0x9   :  { %p74_p3 = scmp.ne.s32.totalorder %s18_s10, %s73_s18  ;;  %p79_p5 = scmp.lt.s32.totalorder %s73_s18, %s73_s18 }
   0xb   :  { %p80_p6 = por %p79_p5, %p78_p4 }
   0xd   :  { %p81_p7 = pnand %p80_p6, %p74_p3 }
   0xf   :  { %84 = shalt.err (!%p81_p7)
}
  0x10   :  { %20 = dma.hbm_to_vmem [thread:$0]  %s158_s1, 64, %s18_s10, [#allocation3]  }
  0x11   :  { %107 = dma.done.wait [#allocation3], 64  }
  0x12   :  { %108 = vsyncadd [#allocation3], 4294967232  ;;  %v112_v0 = vmov 0   ;;  %v24_v1 = vld [vmem:[%s157_s0] sm:$0x3]  ;;  %v36_v7 = vlaneseq  ;;  %s114_s1 = smov [#allocation5]  }
  0x13   :  { %62 = vset.pattern.permute.xlu0 %v112_v0  ;;  %v25_v2 = vadd.f32 0.5, %v24_v1  ;;  %v113_v5 = vmov 269488144   ;;  %v28_v11 = vld [vmem:[#allocation2] sm:$0xf]  ;;  %s49_s23 = sshll.u32 %s114_s1, 4  ;;  %s50_s23 = int_to_ptr.vmem [resolvable:$true] %s49_s23 }
  0x14   :  { %v34_v6 = vunpack.c.l.s4 %v113_v5  ;;  %v37_v9 = vshrl.u32 %v36_v7, 7  ;;  %s85_s24 = scalar_lea.vmem %s50_s23, 64  ;;  %p90_p9 = scmp.lt.s32.totalorder %s50_s23, %s50_s23 }
  0x15   :  { %v26_v3 = vfloor.f32 %v25_v2  ;;  %p86_p8 = scmp.ne.s32.totalorder %s50_s23, %s85_s24  ;;  %p91_p10 = scmp.lt.s32.totalorder %s85_s24, %s85_s24 }
  0x16   :  { %v35_v8 = vunpack.c.0.s8 %v34_v6 }
  0x17   :  { %v27_v4 = vmul.f32 2.0, %v26_v3  ;;  %p92_p11 = por %p91_p10, %p90_p9 }
  0x18   :  { %v38_v10 = vsub.s32 %v35_v8, %v37_v9 }
  0x19   :  { %31 = vperm.xlu0 %62, %v27_v4   ;;  %p93_p12 = pnand %p92_p11, %p86_p8 }
  0x98   :  { %v32_v12 = vpop.permute.xlu0 %31 }
  0x99   :  { %v39_v13 = vrot.slane %v32_v12, %v38_v10 }
  0x9b   :  { %v41_v14 = vmul.f32 %v39_v13, %v28_v11 }
  0x9d   :  { %42 = vst [vmem:[#allocation5] sm:$0xf] %v41_v14 }
  0x9e   :  { %96 = shalt.err (!%p93_p12)
}
  0x9f   :  { %s97_s26 = scalar_lea.hbm %s159_s2, 64 }
  0xa0   :  { %p98_p13 = scmp.ne.s32.totalorder %s159_s2, %s97_s26  ;;  %p101_p0 = scmp.lt.u32.totalorder %s97_s26, %s159_s2 }
  0xa2   :  { %p103_p1 = pnand %p101_p0, %p98_p13 }
  0xa4   :  { %106 = shalt.err (!%p103_p1)
}
  0xa5   :  { %52 = dma.vmem_to_hbm [thread:$0]  %s50_s23, 64, %s159_s2, [#allocation4]  }
  0xa6   :  { %109 = dma.done.wait [#allocation4], 64  }
  0xa7   :  { %110 = vsyncadd [#allocation4], 4294967232 }
  0xa8   :  { %56 = vsyncpa [#allocation3], 1 }
  0xa9   :  { %57 = vsyncpa [#allocation4], 1 }

</bundles_post_ra>
